<compile_context>
chip_gen: v7x
topology: tpu7x:2x2x1
jax: 0.10.0
libtpu: 0.0.40
codegen_flags: <defaults>
</compile_context>

<pallas_src>
import jax
import jax.numpy as jnp
from jax.experimental import pallas as pl
from jax.experimental.pallas import tpu as pltpu

_SUBLANE = 8                    # sublanes per vreg (32-bit dtypes)
_COLS = 512                     # lane-dense last dim (multiple of 128)
_TARGET_TILE_BYTES = 1 << 20    # ~1 MiB per buffer -> 2 ops x 2 bufs = 4 MiB


def _neg_abs_kernel(x_ref, o_ref):
    x = x_ref[...]
    # single VPU vmin instead of abs + negate
    o_ref[...] = jnp.minimum(x, -x)


@jax.jit
def neg_abs(x):
    """Computes -abs(x) elementwise via a tiled, pipelined Pallas TPU kernel."""
    orig_shape = x.shape
    flat = x.reshape(-1)
    n = flat.shape[0]
    dtype = flat.dtype
    itemsize = jnp.dtype(dtype).itemsize

    # ---- choose a lane/sublane-dense tiling (all static Python ints) ------
    cols = _COLS
    rows_needed = -(-n // cols)                                   # ceil
    rows_aligned = -(-rows_needed // _SUBLANE) * _SUBLANE         # mult of 8
    tile_rows = max(
        _SUBLANE,
        (_TARGET_TILE_BYTES // (cols * itemsize)) // _SUBLANE * _SUBLANE,
    )
    tile_rows = min(tile_rows, rows_aligned)                      # don't over-pad tiny inputs

    num_blocks = -(-rows_needed // tile_rows)
    rows_total = num_blocks * tile_rows
    n_pad = rows_total * cols

    flat_p = jnp.pad(flat, (0, n_pad - n)) if n_pad != n else flat
    x2d = flat_p.reshape(rows_total, cols)

    out = pl.pallas_call(
        _neg_abs_kernel,
        out_shape=jax.ShapeDtypeStruct((rows_total, cols), dtype),
        grid=(num_blocks,),
        in_specs=[pl.BlockSpec((tile_rows, cols), lambda i: (i, 0),
                               memory_space=pltpu.MemorySpace.VMEM)],
        out_specs=pl.BlockSpec((tile_rows, cols), lambda i: (i, 0),
                               memory_space=pltpu.MemorySpace.VMEM),
        input_output_aliases={0: 0},   # halve HBM footprint; input not reused
        compiler_params=pltpu.CompilerParams(
            dimension_semantics=("parallel",)),
    )(x2d)

    return out.reshape(-1)[:n].reshape(orig_shape)


if __name__ == "__main__":
    key = jax.random.PRNGKey(0)

    # 1) the exact tensor from the torch spec
    x1 = jnp.array([17, 25, 89, 39, 16, 82, 24, 62, 68, 37], dtype=jnp.int32)
    # 2) random signed ints
    x_rand = jax.random.randint(key, (10,), minval=-100, maxval=100,
                                dtype=jnp.int32)
    # 3) larger ragged float input: exercises padding + multi-block grid
    x_big = jax.random.normal(key, (600001,), dtype=jnp.float32)

    y1 = jax.block_until_ready(neg_abs(x1))
    y2 = jax.block_until_ready(neg_abs(x_rand))
    y3 = jax.block_until_ready(neg_abs(x_big))

    assert jnp.array_equal(y1, -jnp.abs(x1)), (y1, -jnp.abs(x1))
    assert jnp.array_equal(y2, -jnp.abs(x_rand)), (y2, -jnp.abs(x_rand))
    assert jnp.array_equal(y3, -jnp.abs(x_big))
    assert y1.shape == x1.shape and y1.dtype == x1.dtype
    assert y3.shape == x_big.shape and y3.dtype == x_big.dtype

    print("KERNEL_OK")
</pallas_src>

<mosaic_0001>
module attributes {stable_mosaic.version = 11 : i64} {
  func.func @_neg_abs_kernel(%arg0: i32, %arg1: memref<8x512xi32, #tpu.memory_space<vmem>>, %arg2: memref<8x512xi32, #tpu.memory_space<vmem>>) attributes {dimension_semantics = [#tpu.dimension_semantics<parallel>], iteration_bounds = array<i64: 1>, scalar_prefetch = 0 : i64, scratch_operands = 0 : i64, tpu.core_type = #tpu.core_type<tc>, window_params = [{transform_indices = @transform_0, window_bounds = array<i64: 8, 512>}, {transform_indices = @transform_1, window_bounds = array<i64: 8, 512>}]} {
    %c0 = arith.constant 0 : index
    %c0_0 = arith.constant 0 : index
    %0 = vector.load %arg1[%c0, %c0_0] : memref<8x512xi32, #tpu.memory_space<vmem>>, vector<8x512xi32>
    %c0_i32 = arith.constant 0 : i32
    %1 = vector.broadcast %c0_i32 : i32 to vector<8x512xi32>
    %2 = arith.subi %1, %0 : vector<8x512xi32>
    %3 = arith.minsi %0, %2 : vector<8x512xi32>
    %c0_1 = arith.constant 0 : index
    %c0_2 = arith.constant 0 : index
    %4 = vector.load %arg2[%c0_1, %c0_2] : memref<8x512xi32, #tpu.memory_space<vmem>>, vector<8x512xi32>
    tpu.vector_store %arg2[%c0_1, %c0_2], %3 {strides = array<i32>} : memref<8x512xi32, #tpu.memory_space<vmem>>, vector<8x512xi32>,
    return
  }
  func.func @transform_0(%arg0: i32) -> (i32, i32) {
    %c0_i32 = arith.constant 0 : i32
    %c0_i32_0 = arith.constant 0 : i32
    return %arg0, %c0_i32 : i32, i32
  }
  func.func @transform_1(%arg0: i32) -> (i32, i32) {
    %c0_i32 = arith.constant 0 : i32
    %c0_i32_0 = arith.constant 0 : i32
    return %arg0, %c0_i32 : i32, i32
  }
}

</mosaic_0001>

<bundles_post_ra>
// kernel: neg_abs.1
= control target key start
LH: loop header
LB: loop body
LE: loop exit
PB: predicated region body
PF: predicated region fallthrough
CT: control target
= control target key end

     0   :  { %s66_s0 = inlined_call_operand.vmem [shape: s32[8,512], index: 0, kind: input, shape index: {}, may-alias: {0,1}]   ;;  %s67_s1 = inlined_call_operand.vmem [shape: s32[8,512], index: 1, kind: output, shape index: {}, may-alias: {0,1}]  }
   0x1   :  { %v8_v0 = vld [vmem:[%s66_s0] sm:$0xff]  ;;  %v9_v1 = vld [vmem:[%s66_s0 + $0x8] sm:$0xff]  ;;  %v10_v2 = vld [vmem:[%s66_s0 + $0x10] sm:$0xff] }
   0x2   :  { %v12_v3 = vsub.s32 0, %v8_v0  ;;  %v13_v4 = vsub.s32 0, %v9_v1  ;;  %v14_v5 = vsub.s32 0, %v10_v2  ;;  %v11_v6 = vld [vmem:[%s66_s0 + $0x18] sm:$0xff] }
   0x3   :  { %v15_v7 = vsub.s32 0, %v11_v6 }
   0x4   :  { %vm16_vm0 = vcmp.lt.s32.totalorder %v8_v0, %v12_v3  ;;  %vm18_vm1 = vcmp.lt.s32.totalorder %v9_v1, %v13_v4  ;;  %vm20_vm2 = vcmp.lt.s32.totalorder %v10_v2, %v14_v5 }
   0x5   :  { %v17_v8 = vsel %vm16_vm0, %v8_v0, %v12_v3  ;;  %v19_v9 = vsel %vm18_vm1, %v9_v1, %v13_v4  ;;  %v21_v10 = vsel %vm20_vm2, %v10_v2, %v14_v5  ;;  %vm22_vm3 = vcmp.lt.s32.totalorder %v11_v6, %v15_v7 }
   0x6   :  { %24 = vst [vmem:[%s67_s1] sm:$0xff] %v17_v8  ;;  %25 = vst [vmem:[%s67_s1 + $0x8] sm:$0xff] %v19_v9  ;;  %v23_v11 = vsel %vm22_vm3, %v11_v6, %v15_v7 }
   0x7   :  { %26 = vst [vmem:[%s67_s1 + $0x10] sm:$0xff] %v21_v10  ;;  %27 = vst [vmem:[%s67_s1 + $0x18] sm:$0xff] %v23_v11 }

</bundles_post_ra>
